<compile_context>
chip_gen: v5e
topology: v5e:2x2
jax: 0.10.0
libtpu: 0.0.40
codegen_flags: <defaults>
</compile_context>

<pallas_src>
import functools

import jax
import jax.numpy as jnp
from jax.experimental import pallas as pl
from jax.experimental.pallas import tpu as pltpu

LANES = 128
MAX_BLOCK_ROWS = 1024   # 1024 x 128 f32 = 512 KiB per input per buffer
NCORES = 2              # leading "parallel" grid axis (v7x has 2 TCs/chip)


def _dice_partial_kernel(x_ref, t_ref, inter_out, total_out,
                         inter_acc, total_acc, *, n_valid, tr, spc):
    """Accumulates per-core partial sums of sigmoid(x)*t and sigmoid(x)+t."""
    c = pl.program_id(0)           # core split (parallel)
    i = pl.program_id(1)           # reduction steps within this core

    @pl.when(i == 0)
    def _init():
        inter_acc[...] = jnp.zeros_like(inter_acc)
        total_acc[...] = jnp.zeros_like(total_acc)

    x = jax.nn.sigmoid(x_ref[...].astype(jnp.float32))
    t = t_ref[...].astype(jnp.float32)

    # Mask tail / out-of-range elements of this *logical* block.  The index
    # map clamps the DMA to a valid block, so out-of-range logical positions
    # may alias real data -- the mask (computed from the logical position)
    # zeroes their contribution either way.
    blk = c * spc + i
    row = jax.lax.broadcasted_iota(jnp.int32, (tr, LANES), 0)
    col = jax.lax.broadcasted_iota(jnp.int32, (tr, LANES), 1)
    flat = (blk * tr + row) * LANES + col
    valid = flat < n_valid
    x = jnp.where(valid, x, 0.0)
    t = jnp.where(valid, t, 0.0)

    prod = x * t       # -> sum(x*t) stream
    both = x + t       # -> sum(x) + sum(t) fused into one stream
    if tr % 8 == 0:
        # (tr, 128) is tr//8 stacked vregs; summing over the leading axis is
        # pure elementwise VPU adds into a single vreg-shaped accumulator.
        inter_acc[...] += prod.reshape(-1, 8, LANES).sum(axis=0)
        total_acc[...] += both.reshape(-1, 8, LANES).sum(axis=0)
    else:
        # tiny-input fallback (single block with an odd row count)
        inter_acc[...] += prod.sum(axis=0, keepdims=True)
        total_acc[...] += both.sum(axis=0, keepdims=True)

    @pl.when(i == pl.num_programs(1) - 1)
    def _finalize():
        inter_out[0] = inter_acc[...]
        total_out[0] = total_acc[...]


def dice_loss(inputs, targets, smooth=1.0):
    """Pallas implementation of DiceLoss.forward (returns scalar f32)."""
    x_flat = inputs.reshape(-1)          # keep native dtype (bf16 stays bf16)
    t_flat = targets.reshape(-1)
    n = x_flat.shape[0]

    # Lane-dense (rows, 128) view.  A copy is only required when the element
    # count is not a multiple of 128 (rare for conv feature maps); pad values
    # are irrelevant because the kernel masks by the valid element count.
    rows = -(-n // LANES)
    n_pad = rows * LANES
    if n_pad != n:
        x_flat = jnp.pad(x_flat, (0, n_pad - n))
        t_flat = jnp.pad(t_flat, (0, n_pad - n))
    x2d = x_flat.reshape(rows, LANES)
    t2d = t_flat.reshape(rows, LANES)

    # Block rows: large enough to amortize per-step overhead, small enough to
    # be VMEM-safe on every generation (v5e 16 MiB scoped ... v7x 64 MiB).
    tr = MAX_BLOCK_ROWS if rows >= MAX_BLOCK_ROWS else rows
    nblocks = -(-rows // tr)
    spc = -(-nblocks // NCORES)          # reduction steps per core
    acc_rows = 8 if tr % 8 == 0 else 1

    def in_index_map(c, i):
        # Clamp so the DMA never targets an out-of-range block; the kernel
        # masks the contribution of clamped (duplicate) blocks to zero.
        return (jnp.minimum(c * spc + i, nblocks - 1), 0)

    kernel = functools.partial(_dice_partial_kernel, n_valid=n, tr=tr, spc=spc)

    inter_p, total_p = pl.pallas_call(
        kernel,
        out_shape=(
            jax.ShapeDtypeStruct((NCORES, acc_rows, LANES), jnp.float32),
            jax.ShapeDtypeStruct((NCORES, acc_rows, LANES), jnp.float32),
        ),
        grid_spec=pltpu.PrefetchScalarGridSpec(
            num_scalar_prefetch=0,
            grid=(NCORES, spc),
            in_specs=[
                pl.BlockSpec((tr, LANES), in_index_map),
                pl.BlockSpec((tr, LANES), in_index_map),
            ],
            out_specs=(
                pl.BlockSpec((1, acc_rows, LANES), lambda c, i: (c, 0, 0)),
                pl.BlockSpec((1, acc_rows, LANES), lambda c, i: (c, 0, 0)),
            ),
            scratch_shapes=[
                pltpu.VMEM((acc_rows, LANES), jnp.float32),
                pltpu.VMEM((acc_rows, LANES), jnp.float32),
            ],
        ),
        compiler_params=pltpu.CompilerParams(
            dimension_semantics=("parallel", "arbitrary")),
    )(x2d, t2d)

    # Final (tiny) cross-lane reduction + dice formula on the combined sums.
    intersection = jnp.sum(inter_p)
    total = jnp.sum(total_p)
    smooth = jnp.float32(smooth)
    dice = (2.0 * intersection + smooth) / (total + smooth)
    return 1.0 - dice


def _dice_loss_ref(inputs, targets, smooth=1.0):
    x = jax.nn.sigmoid(inputs.astype(jnp.float32)).reshape(-1)
    t = targets.astype(jnp.float32).reshape(-1)
    intersection = jnp.sum(x * t)
    dice = (2.0 * intersection + smooth) / (jnp.sum(x) + jnp.sum(t) + smooth)
    return 1.0 - dice


if __name__ == "__main__":
    key = jax.random.PRNGKey(0)

    test_cases = [
        ((2, 4, 16, 16), jnp.float32),    # small seg head (spec shape)
        ((2, 3, 7, 9), jnp.float32),      # ragged: exercises tail masking
        ((2, 4, 128, 130), jnp.float32),  # multi-block + partial last block
        ((2, 4, 16, 16), jnp.bfloat16),   # native low-precision logits
    ]
    for idx, (shape, dtype) in enumerate(test_cases):
        k1, k2 = jax.random.split(jax.random.fold_in(key, idx))
        inputs = jax.random.normal(k1, shape, dtype=jnp.float32).astype(dtype)
        targets = (jax.random.uniform(k2, shape) > 0.5).astype(dtype)

        loss = jax.block_until_ready(dice_loss(inputs, targets, smooth=1.0))
        ref = _dice_loss_ref(inputs, targets, smooth=1.0)
        assert jnp.allclose(loss, ref, atol=2e-5, rtol=1e-4), (
            shape, dtype, loss, ref)

    print("KERNEL_OK")
</pallas_src>

<mosaic_0001>
module attributes {stable_mosaic.version = 11 : i64} {
  func.func @_dice_partial_kernel(%arg0: i32, %arg1: i32, %arg2: memref<16x128xf32, #tpu.memory_space<vmem>>, %arg3: memref<16x128xf32, #tpu.memory_space<vmem>>, %arg4: memref<1x8x128xf32, #tpu.memory_space<vmem>>, %arg5: memref<1x8x128xf32, #tpu.memory_space<vmem>>, %arg6: memref<8x128xf32, #tpu.memory_space<vmem>>, %arg7: memref<8x128xf32, #tpu.memory_space<vmem>>) attributes {dimension_semantics = [#tpu.dimension_semantics<parallel>, #tpu.dimension_semantics<arbitrary>], iteration_bounds = array<i64: 2, 1>, scalar_prefetch = 0 : i64, scratch_operands = 2 : i64, tpu.core_type = #tpu.core_type<tc>, window_params = [{transform_indices = @transform_0, window_bounds = array<i64: 16, 128>}, {transform_indices = @transform_1, window_bounds = array<i64: 16, 128>}, {transform_indices = @transform_2, window_bounds = array<i64: 1, 8, 128>}, {transform_indices = @transform_3, window_bounds = array<i64: 1, 8, 128>}]} {
    %c0_i32 = arith.constant 0 : i32
    %0 = arith.cmpi eq, %arg1, %c0_i32 : i32
    %1 = arith.extui %0 : i1 to i32
    %c0_i32_0 = arith.constant 0 : i32
    %2 = arith.cmpi ne, %1, %c0_i32_0 : i32
    scf.if %2 {
      %cst_18 = arith.constant 0.000000e+00 : f32
      %41 = vector.broadcast %cst_18 : f32 to vector<8x128xf32>
      %c0_19 = arith.constant 0 : index
      %c0_20 = arith.constant 0 : index
      %42 = vector.load %arg6[%c0_19, %c0_20] : memref<8x128xf32, #tpu.memory_space<vmem>>, vector<8x128xf32>
      tpu.vector_store %arg6[%c0_19, %c0_20], %41 {strides = array<i32>} : memref<8x128xf32, #tpu.memory_space<vmem>>, vector<8x128xf32>,
      %cst_21 = arith.constant 0.000000e+00 : f32
      %43 = vector.broadcast %cst_21 : f32 to vector<8x128xf32>
      %c0_22 = arith.constant 0 : index
      %c0_23 = arith.constant 0 : index
      %44 = vector.load %arg7[%c0_22, %c0_23] : memref<8x128xf32, #tpu.memory_space<vmem>>, vector<8x128xf32>
      tpu.vector_store %arg7[%c0_22, %c0_23], %43 {strides = array<i32>} : memref<8x128xf32, #tpu.memory_space<vmem>>, vector<8x128xf32>,
    } else {
    }
    %c0 = arith.constant 0 : index
    %c0_1 = arith.constant 0 : index
    %3 = vector.load %arg2[%c0, %c0_1] : memref<16x128xf32, #tpu.memory_space<vmem>>, vector<16x128xf32>
    %4 = arith.negf %3 : vector<16x128xf32>
    %5 = math.exp %4 : vector<16x128xf32>
    %cst = arith.constant 1.000000e+00 : f32
    %6 = vector.broadcast %cst : f32 to vector<16x128xf32>
    %7 = arith.addf %6, %5 : vector<16x128xf32>
    %8 = arith.divf %6, %7 : vector<16x128xf32>
    %c0_2 = arith.constant 0 : index
    %c0_3 = arith.constant 0 : index
    %9 = vector.load %arg3[%c0_2, %c0_3] : memref<16x128xf32, #tpu.memory_space<vmem>>, vector<16x128xf32>
    %c1_i32 = arith.constant 1 : i32
    %10 = arith.muli %arg0, %c1_i32 : i32
    %11 = arith.addi %10, %arg1 : i32
    %12 = tpu.iota {dimensions = array<i32: 0>} : vector<16x128xi32>
    %13 = tpu.iota {dimensions = array<i32: 1>} : vector<16x128xi32>
    %c16_i32 = arith.constant 16 : i32
    %14 = arith.muli %11, %c16_i32 : i32
    %15 = vector.broadcast %14 : i32 to vector<16x128xi32>
    %16 = arith.addi %15, %12 : vector<16x128xi32>
    %c128_i32 = arith.constant 128 : i32
    %17 = vector.broadcast %c128_i32 : i32 to vector<16x128xi32>
    %18 = arith.muli %16, %17 : vector<16x128xi32>
    %19 = arith.addi %18, %13 : vector<16x128xi32>
    %c2048_i32 = arith.constant 2048 : i32
    %20 = vector.broadcast %c2048_i32 : i32 to vector<16x128xi32>
    %21 = arith.cmpi slt, %19, %20 : vector<16x128xi32>
    %cst_4 = arith.constant 0.000000e+00 : f32
    %22 = vector.broadcast %cst_4 : f32 to vector<16x128xf32>
    %23 = arith.select %21, %8, %22 : vector<16x128xi1>, vector<16x128xf32>
    %cst_5 = arith.constant 0.000000e+00 : f32
    %24 = vector.broadcast %cst_5 : f32 to vector<16x128xf32>
    %25 = arith.select %21, %9, %24 : vector<16x128xi1>, vector<16x128xf32>
    %26 = arith.mulf %23, %25 : vector<16x128xf32>
    %27 = arith.addf %23, %25 : vector<16x128xf32>
    %c0_6 = arith.constant 0 : index
    %c0_7 = arith.constant 0 : index
    %28 = vector.load %arg6[%c0_6, %c0_7] : memref<8x128xf32, #tpu.memory_space<vmem>>, vector<8x128xf32>
    %29 = vector.shape_cast %26 : vector<16x128xf32> to vector<2x8x128xf32>
    %cst_8 = arith.constant dense<0.000000e+00> : vector<8x128xf32>
    %30 = vector.multi_reduction <add>, %29, %cst_8 [0] : vector<2x8x128xf32> to vector<8x128xf32>
    %31 = arith.addf %28, %30 : vector<8x128xf32>
    %c0_9 = arith.constant 0 : index
    %c0_10 = arith.constant 0 : index
    %32 = vector.load %arg6[%c0_9, %c0_10] : memref<8x128xf32, #tpu.memory_space<vmem>>, vector<8x128xf32>
    tpu.vector_store %arg6[%c0_9, %c0_10], %31 {strides = array<i32>} : memref<8x128xf32, #tpu.memory_space<vmem>>, vector<8x128xf32>,
    %c0_11 = arith.constant 0 : index
    %c0_12 = arith.constant 0 : index
    %33 = vector.load %arg7[%c0_11, %c0_12] : memref<8x128xf32, #tpu.memory_space<vmem>>, vector<8x128xf32>
    %34 = vector.shape_cast %27 : vector<16x128xf32> to vector<2x8x128xf32>
    %cst_13 = arith.constant dense<0.000000e+00> : vector<8x128xf32>
    %35 = vector.multi_reduction <add>, %34, %cst_13 [0] : vector<2x8x128xf32> to vector<8x128xf32>
    %36 = arith.addf %33, %35 : vector<8x128xf32>
    %c0_14 = arith.constant 0 : index
    %c0_15 = arith.constant 0 : index
    %37 = vector.load %arg7[%c0_14, %c0_15] : memref<8x128xf32, #tpu.memory_space<vmem>>, vector<8x128xf32>
    tpu.vector_store %arg7[%c0_14, %c0_15], %36 {strides = array<i32>} : memref<8x128xf32, #tpu.memory_space<vmem>>, vector<8x128xf32>,
    %c0_i32_16 = arith.constant 0 : i32
    %38 = arith.cmpi eq, %arg1, %c0_i32_16 : i32
    %39 = arith.extui %38 : i1 to i32
    %c0_i32_17 = arith.constant 0 : i32
    %40 = arith.cmpi ne, %39, %c0_i32_17 : i32
    scf.if %40 {
      %c0_18 = arith.constant 0 : index
      %c0_19 = arith.constant 0 : index
      %41 = vector.load %arg6[%c0_18, %c0_19] : memref<8x128xf32, #tpu.memory_space<vmem>>, vector<8x128xf32>
      %c0_20 = arith.constant 0 : index
      %c0_21 = arith.constant 0 : index
      %c0_22 = arith.constant 0 : index
      %42 = vector.load %arg4[%c0_20, %c0_21, %c0_22] : memref<1x8x128xf32, #tpu.memory_space<vmem>>, vector<1x8x128xf32>
      %43 = vector.shape_cast %42 : vector<1x8x128xf32> to vector<8x128xf32>
      %44 = vector.shape_cast %41 : vector<8x128xf32> to vector<1x8x128xf32>
      tpu.vector_store %arg4[%c0_20, %c0_21, %c0_22], %44 {strides = array<i32>} : memref<1x8x128xf32, #tpu.memory_space<vmem>>, vector<1x8x128xf32>,
      %c0_23 = arith.constant 0 : index
      %c0_24 = arith.constant 0 : index
      %45 = vector.load %arg7[%c0_23, %c0_24] : memref<8x128xf32, #tpu.memory_space<vmem>>, vector<8x128xf32>
      %c0_25 = arith.constant 0 : index
      %c0_26 = arith.constant 0 : index
      %c0_27 = arith.constant 0 : index
      %46 = vector.load %arg5[%c0_25, %c0_26, %c0_27] : memref<1x8x128xf32, #tpu.memory_space<vmem>>, vector<1x8x128xf32>
      %47 = vector.shape_cast %46 : vector<1x8x128xf32> to vector<8x128xf32>
      %48 = vector.shape_cast %45 : vector<8x128xf32> to vector<1x8x128xf32>
      tpu.vector_store %arg5[%c0_25, %c0_26, %c0_27], %48 {strides = array<i32>} : memref<1x8x128xf32, #tpu.memory_space<vmem>>, vector<1x8x128xf32>,
    } else {
    }
    return
  }
  func.func @transform_0(%arg0: i32, %arg1: i32) -> (i32, i32) {
    %c1_i32 = arith.constant 1 : i32
    %0 = arith.muli %arg0, %c1_i32 : i32
    %1 = arith.addi %0, %arg1 : i32
    %c0_i32 = arith.constant 0 : i32
    %2 = arith.minsi %1, %c0_i32 : i32
    %c0_i32_0 = arith.constant 0 : i32
    %c0_i32_1 = arith.constant 0 : i32
    return %2, %c0_i32_0 : i32, i32
  }
  func.func @transform_1(%arg0: i32, %arg1: i32) -> (i32, i32) {
    %c1_i32 = arith.constant 1 : i32
    %0 = arith.muli %arg0, %c1_i32 : i32
    %1 = arith.addi %0, %arg1 : i32
    %c0_i32 = arith.constant 0 : i32
    %2 = arith.minsi %1, %c0_i32 : i32
    %c0_i32_0 = arith.constant 0 : i32
    %c0_i32_1 = arith.constant 0 : i32
    return %2, %c0_i32_0 : i32, i32
  }
  func.func @transform_2(%arg0: i32, %arg1: i32) -> (i32, i32, i32) {
    %c0_i32 = arith.constant 0 : i32
    %c0_i32_0 = arith.constant 0 : i32
    %c0_i32_1 = arith.constant 0 : i32
    return %arg0, %c0_i32, %c0_i32_0 : i32, i32, i32
  }
  func.func @transform_3(%arg0: i32, %arg1: i32) -> (i32, i32, i32) {
    %c0_i32 = arith.constant 0 : i32
    %c0_i32_0 = arith.constant 0 : i32
    %c0_i32_1 = arith.constant 0 : i32
    return %arg0, %c0_i32, %c0_i32_0 : i32, i32, i32
  }
}

</mosaic_0001>

<bundles_post_ra>
// kernel: tpu_custom_call.1
= control target key start
LH: loop header
LB: loop body
LE: loop exit
PB: predicated region body
PF: predicated region fallthrough
CT: control target
= control target key end

     0   :  { %9 = vsyncpa [#allocation5], 0  ;;  %s1101_s0 = inlined_call_operand.hbm [shape: f32[16,128], index: 0, kind: input, shape index: {}]   ;;  %s1102_s1 = inlined_call_operand.hbm [shape: f32[16,128], index: 1, kind: input, shape index: {}]   ;;  %s1103_s2 = inlined_call_operand.hbm [shape: f32[2,8,128], index: 2, kind: output, shape index: {0}]   ;;  %s1104_s3 = inlined_call_operand.hbm [shape: f32[2,8,128], index: 3, kind: output, shape index: {1}]  }
   0x1   :  { %11 = vsyncpa [#allocation5 + $0x1], 0 }
   0x2   :  { %12 = vsyncpa [#allocation8], 0 }
   0x3   :  { %14 = vsyncpa [#allocation8 + $0x1], 0 }
   0x4   :  { %15 = vsyncpa [#allocation6], 0 }
   0x5   :  { %17 = vsyncpa [#allocation6 + $0x1], 0 }
   0x6   :  { %18 = vsyncpa [#allocation11], 0 }
   0x7   :  { %20 = vsyncpa [#allocation11 + $0x1], 0  ;;  %s895_s12 = smov 0   ;;  %s897_s13 = smov 0  }
   0x8   :  { %s899_s14 = smov 0   ;;  %s901_s15 = smov 0  }
   0x9   :  { %s903_s16 = smov 0   ;;  %s905_s17 = smov 0  }
   0xa   :  { %s907_s18 = smov 0   ;;  %s909_s19 = smov 0  }
   0xb LB: > { %s538_s20 = sadd.s32 4294967295, %s869_s19   ;;  %s539_s21 = sadd.s32 4294967294, %s869_s19   ;;  %s869_s19 = sphi %s909_s19, %s26_s19   ;;  %s865_s18 = sphi %s907_s18, %s1118_s18   ;;  %s861_s17 = sphi %s905_s17, %s1117_s17   ;;  %s857_s16 = sphi %s903_s16, %s1091_s16   ;;  %s853_s15 = sphi %s901_s15, %s1116_s15   ;;  %s849_s14 = sphi %s899_s14, %s1115_s14   ;;  %s845_s13 = sphi %s897_s13, %s1114_s13   ;;  %s841_s12 = sphi %s895_s12, %s1113_s12  }
   0xc   : > { %s38_s22 = sadd.s32 1, %s865_s18  ;;  %p838_p1 = scmp.ne.s32.totalorder %s857_s16, 0 }
   0xd   : > { %p40_p0 = scmp.ge.s32.totalorder %s38_s22, 2  ;;  %p59_p2 = scmp.eq.s32.totalorder %s869_s19, 0 }
   0xe   : > { %p64_p3 = scmp.ne.s32.totalorder %s857_s16, %s853_s15  ;;  %p65_p5 = scmp.eq.s32.totalorder %s538_s20, 0 }
   0xf   : > { %s1120_s22 = smov (%p40_p0, %s38_s22), 0  ;;  %p941_p4 = por %p838_p1, %p59_p2 }
  0x10   : > { %p945_p6 = por %p65_p5, %p64_p3  ;;  %s106_s25 = ssub.s32 %s865_s18, %s1120_s22 }
  0x11   : > { %p107_p7 = scmp.eq.s32.totalorder %s106_s25, 0  ;;  %s109_s26 = sadd.s32 1, %s849_s14 }
  0x12   : > { %p119_p8 = scmp.ne.s32.totalorder %s849_s14, %s845_s13  ;;  %p120_p9 = scmp.eq.s32.totalorder %s538_s20, 1 }
  0x13   : > { %s953_s27 = scalar_select %p107_p7, %s849_s14, %s109_s26  }
  0x14   : > { %p125_p10 = scmp.ne.s32.totalorder %s845_s13, %s841_s12  ;;  %p126_p11 = scmp.eq.s32.totalorder %s539_s21, 1 }
  0x15   : > { %p959_p12 = por %p120_p9, %p119_p8  ;;  %p541_p13 = scmp.ge.s32.totalorder %s869_s19, 2 }
  0x16   : > { %p964_p0 = por %p126_p11, %p125_p10  ;;  %p586_p1 = scmp.lt.s32.totalorder %s869_s19, 2 }
  0x17   : > { %s185_s5 = sshll.u32 %s1101_s0, 4  ;;  %s871_s6 = smov [#allocation4]   ;;  %s186_s5 = int_to_ptr.hbm [resolvable:$true] %s185_s5 }
  0x18   : > { %s187_s7 = sshll.u32 %s871_s6, 4  ;;  %p974_p2 = pnand %p586_p1, %p941_p4  ;;  %s188_s7 = int_to_ptr.vmem [resolvable:$true] %s187_s7 }
  0x19   : > { %p548_p3 = scmp.ge.s32.totalorder %s869_s19, 1  ;;  %p220_p5 = scmp.lt.s32.totalorder %s869_s19, 3 }
  0x1a   : > { %s670_s9 = sshra.s32 %s186_s5, 4  ;;  %p674_p8 = pneg %p974_p2  ;;  %s671_s9 = int_to_ptr.hbm [resolvable:$true] %s670_s9 }
  0x1b   : > { %s672_s10 = scalar_lea.hbm %s671_s9, 16  ;;  %s677_s20 = scalar_lea.hbm %s1101_s0, 16 }
  0x1c   : > { %p673_p7 = scmp.ne.s32.totalorder %s671_s9, %s672_s10  ;;  %p679_p4 = scmp.lt.s32.totalorder %s677_s20, %s672_s10 }
  0x1e   : > { %p675_p9 = pnand %p674_p8, %p673_p7 }
  0x20   : > { %p676_p10 = pneg %p675_p9 }
  0x22   : > { %p681_p11 = pnand %p679_p4, %p676_p10 }
  0x24   : > { %684 = shalt.err (!%p681_p11)
}
  0x25   : > { %s872_s21 = smov 128   ;;  %s873_s23 = smov 8  }
  0x26   : > { %575 = dma.hbm_to_vmem [thread:$0]  (!%p974_p2), %s186_s5, 256, %s188_s7, [#allocation5], %s872_s21, %s872_s21, %s873_s23  }
  0x27   : > { %p994_p1 = pnand %p548_p3, %p220_p5  ;;  %s210_s4 = sshll.u32 %s1102_s1, 4  ;;  %s211_s4 = int_to_ptr.hbm [resolvable:$true] %s210_s4 }
  0x28   : > { %s874_s6 = smov [#allocation7]   ;;  %s700_s10 = sshra.s32 %s211_s4, 4  ;;  %s701_s10 = int_to_ptr.hbm [resolvable:$true] %s700_s10 }
  0x29   : > { %s212_s9 = sshll.u32 %s874_s6, 4  ;;  %s702_s11 = scalar_lea.hbm %s701_s10, 16  ;;  %s213_s9 = int_to_ptr.vmem [resolvable:$true] %s212_s9 }
  0x2a   : > { %p703_p7 = scmp.ne.s32.totalorder %s701_s10, %s702_s11  ;;  %s707_s15 = scalar_lea.hbm %s1102_s1, 16 }
  0x2b   : > { %p709_p3 = scmp.lt.s32.totalorder %s707_s15, %s702_s11 }
  0x2c   : > { %p705_p9 = pnand %p703_p7, %p674_p8 }
  0x2e   : > { %p706_p10 = pneg %p705_p9 }
  0x30   : > { %p711_p5 = pnand %p709_p3, %p706_p10 }
  0x32   : > { %714 = shalt.err (!%p711_p5)
}
  0x33   : > { %578 = dma.hbm_to_vmem [thread:$0]  (!%p974_p2), %s211_s4, 256, %s213_s9, [#allocation8], %s872_s21, %s872_s21, %s873_s23  }
  0x34   : > { %224 = sbr.rel (%p994_p1) target bundleno = 111 (0x6f), region = 28  ;;  %s226_s20 = sand.u32 (!%p994_p1), 1, %s857_s16  }
  0x35   : > { %s549_s26 = sshll.u32 (!%p994_p1), %s226_s20, 4  ;;  %s227_s30 = scalar_lea.sflag (!%p994_p1), [#allocation5], %s226_s20 }
  0x36   : > { %s230_s6 = scalar_lea.vmem (!%p994_p1), [#allocation4], %s549_s26 }
  0x39   : > { %823 = dma.done.wait (%p945_p6), %s227_s30, 256  }
  0x3a   : > { %825 = vsyncadd (%p945_p6), %s227_s30, 4294967040  ;;  %s237_s10 = scalar_lea.sflag [#allocation8], %s226_s20  ;;  %s1016_s11 = scalar_lea.vmem [#allocation7], %s549_s26 }
  0x3b   : > { %827 = dma.done.wait (%p945_p6), %s237_s10, 256  }
  0x3c   : > { %829 = vsyncadd (%p945_p6), %s237_s10, 4294967040  ;;  %v288_v0 = vld [vmem:[%s230_s6] sm:$0xff]  ;;  %v289_v1 = vld [vmem:[%s230_s6 + $0x8] sm:$0xff]  ;;  %v331_v2 = vlaneseq  ;;  %s555_s8 = sshll.u32 %s861_s17, 4  ;;  %s1024_s24 = sand.u32 1, %s845_s13  }
  0x3d   : > { %v553_v3 = vmul.f32 -1.442695, %v288_v0  ;;  %v554_v4 = vmul.f32 -1.442695, %v289_v1  ;;  %v337_v7 = vstv %s555_s8  ;;  %s551_s21 = sshll.u32 %s1024_s24, 3  ;;  %v328_v33 = vld [vmem:[%s1016_s11] sm:$0xff] }
  0x3e   : > { %v332_v5 = vshrl.u32 %v331_v2, 7  ;;  %v335_v14 = vand.u32 127, %v331_v2  ;;  %s558_s23 = sshll.u32 %s861_s17, 3  ;;  %v329_v36 = vld [vmem:[%s1016_s11 + $0x8] sm:$0xff]  ;;  %s266_s15 = scalar_lea.vmem [#allocation9], %s551_s21 }
  0x3f   : > { %662 = vpow2.f32 %v553_v3  ;;  %s385_s9 = scalar_lea.hbm %s1103_s2, %s558_s23  ;;  %s399_s7 = scalar_lea.hbm %s1104_s3, %s558_s23 }
  0x40   : > { %664 = vpow2.f32 %v554_v4  ;;  %v333_v6 = vadd.s32 8, %v332_v5  ;;  %v338_v12 = vadd.s32 %v337_v7, %v332_v5  ;;  %s387_s20 = sshll.u32 %s266_s15, 4  ;;  %s273_s26 = scalar_lea.vmem [#allocation10], %s551_s21  ;;  %s388_s20 = int_to_ptr.vmem [resolvable:$true] %s387_s20 }
  0x41   : > { %s401_s30 = sshll.u32 %s273_s26, 4  ;;  %s389_s6 = sshll.u32 %s385_s9, 4  ;;  %s1044_s30 = int_to_ptr.vmem [resolvable:$true] %s401_s30  ;;  %s390_s6 = int_to_ptr.hbm [resolvable:$true] %s389_s6 }
  0x42   : > { %v339_v13 = vadd.s32 %v337_v7, %v333_v6  ;;  %v340_v15 = vmul.u32 128, %v338_v12  ;;  %s403_s10 = sshll.u32 %s399_s7, 4  ;;  %s370_s11 = scalar_lea.sflag [#allocation6], %s1024_s24  ;;  %s1046_s10 = int_to_ptr.hbm [resolvable:$true] %s403_s10 }
  0x43   : > { %s744_s8 = sshra.s32 %s390_s6, 4  ;;  %s750_s4 = scalar_lea.hbm %s1103_s2, 16  ;;  %s745_s8 = int_to_ptr.hbm [resolvable:$true] %s744_s8 }
  0x44   : > { %v341_v16 = vmul.u32 128, %v339_v13  ;;  %v342_v20 = vadd.s32 %v340_v15, %v335_v14  ;;  %s746_s21 = scalar_lea.hbm %s745_s8, 8  ;;  %p751_p4 = scmp.lt.s32.totalorder %s745_s8, %s1103_s2 }
  0x45   : > { %v663_v8 = vpop.eup %662  ;;  %p747_p6 = scmp.ne.s32.totalorder %s745_s8, %s746_s21  ;;  %p752_p11 = scmp.lt.s32.totalorder %s750_s4, %s746_s21 }
  0x46   : > { %v665_v9 = vpop.eup %664  ;;  %v296_v10 = vadd.f32 1.0, %v663_v8  ;;  %v343_v23 = vadd.s32 %v341_v16, %v335_v14  ;;  %vm344_vm5 = vcmp.lt.s32.totalorder %v342_v20, 2048 }
  0x47   : > { %v297_v11 = vadd.f32 1.0, %v665_v9  ;;  %v348_v39 = vsel %vm344_vm5, %v328_v33, 0.0  ;;  %p748_p2 = pnand %p747_p6, %p959_p12  ;;  %p753_p1 = por %p752_p11, %p751_p4 }
  0x48   : > { %666 = vrcp.f32 %v296_v10  ;;  %vm303_vm0 = vweird.f32 %v296_v10  ;;  %v309_v21 = vand.u32 2147483648, %v296_v10  ;;  %v307_v25 = vand.u32 2147483647, %v296_v10 }
  0x49   : > { %668 = vrcp.f32 %v297_v11  ;;  %v324_v26 = vand.u32 2147483648, %v297_v11  ;;  %vm318_vm2 = vweird.f32 %v297_v11  ;;  %v322_v28 = vand.u32 2147483647, %v297_v11  ;;  %p749_p8 = pneg %p748_p2 }
  0x4a   : > { %v310_v31 = vor.u32 1.1754944e-38, %v309_v21  ;;  %vm308_vm6 = vcmp.eq.f32.partialorder %v307_v25, 8.507059e+37  ;;  %vm345_vm8 = vcmp.lt.s32.totalorder %v343_v23, 2048 }
  0x4b   : > { %v325_v35 = vor.u32 1.1754944e-38, %v324_v26  ;;  %vm323_vm9 = vcmp.eq.f32.partialorder %v322_v28, 8.507059e+37  ;;  %v349_v42 = vsel %vm345_vm8, %v329_v36, 0.0  ;;  %p754_p7 = pnand %p753_p1, %p749_p8 }
  0x4e   : > { %v667_v17 = vpop.eup %666 }
  0x4f   : > { %v669_v18 = vpop.eup %668  ;;  %v299_v19 = vmul.f32 %v667_v17, %v296_v10  ;;  %vm304_vm1 = vweird.f32 %v667_v17 }
  0x50   : > { %v314_v22 = vmul.f32 %v669_v18, %v297_v11  ;;  %vm319_vm3 = vweird.f32 %v669_v18  ;;  %vm1027_vm4 = vmor %vm303_vm0, %vm304_vm1 }
  0x51   : > { %v300_v24 = vsub.f32 1.0, %v299_v19  ;;  %vm320_vm7 = vmor %vm318_vm2, %vm319_vm3 }
  0x52   : > { %v315_v27 = vsub.f32 1.0, %v314_v22 }
  0x53   : > { %v301_v29 = vmul.f32 %v667_v17, %v300_v24 }
  0x54   : > { %v316_v32 = vmul.f32 %v669_v18, %v315_v27 }
  0x55   : > { %v302_v34 = vadd.f32 %v667_v17, %v301_v29 }
  0x56   : > { %v317_v37 = vadd.f32 %v669_v18, %v316_v32 }
  0x57   : > { %v306_v38 = vsel %vm1027_vm4, %v667_v17, %v302_v34 }
  0x58   : > { %v311_v40 = vsel %vm308_vm6, %v310_v31, %v306_v38  ;;  %v321_v41 = vsel %vm320_vm7, %v669_v18, %v317_v37 }
  0x59   : > { %v326_v43 = vsel %vm323_vm9, %v325_v35, %v321_v41  ;;  %v346_v44 = vsel %vm344_vm5, %v311_v40, 0.0 }
  0x5a   : > { %v347_v45 = vsel %vm345_vm8, %v326_v43, 0.0  ;;  %v350_v46 = vmul.f32 %v348_v39, %v346_v44  ;;  %v352_v47 = vadd.f32 %v348_v39, %v346_v44 }
  0x5b   : > { %v351_v48 = vmul.f32 %v349_v42, %v347_v45  ;;  %v353_v49 = vadd.f32 %v349_v42, %v347_v45 }
  0x5d   : > { %v355_v50 = vadd.f32 %v351_v48, %v350_v46  ;;  %v359_v51 = vadd.f32 %v353_v49, %v352_v47 }
  0x5f   : > { %366 = vst [vmem:[%s266_s15] sm:$0xff] %v355_v50 }
  0x60   : > { %368 = vst [vmem:[%s273_s26] sm:$0xff] %v359_v51 }
  0x61   : > { %757 = shalt.err (!%p754_p7)
}
  0x62   : > { %568 = dma.vmem_to_hbm [thread:$0]  (%p959_p12), %s388_s20, 128, %s390_s6, %s370_s11  }
  0x63   : > { %s375_s5 = scalar_lea.sflag [#allocation11], %s1024_s24  ;;  %s772_s7 = sshra.s32 %s1046_s10, 4  ;;  %s773_s7 = int_to_ptr.hbm [resolvable:$true] %s772_s7 }
  0x64   : > { %s774_s15 = scalar_lea.hbm %s773_s7, 8  ;;  %s778_s21 = scalar_lea.hbm %s1104_s3, 16 }
  0x65   : > { %p775_p9 = scmp.ne.s32.totalorder %s773_s7, %s774_s15  ;;  %p779_p5 = scmp.lt.s32.totalorder %s773_s7, %s1104_s3 }
  0x66   : > { %p780_p6 = scmp.lt.s32.totalorder %s778_s21, %s774_s15 }
  0x67   : > { %p776_p10 = pnand %p775_p9, %p959_p12 }
  0x68   : > { %p781_p2 = por %p780_p6, %p779_p5 }
  0x69   : > { %p777_p3 = pneg %p776_p10 }
  0x6b   : > { %p782_p8 = pnand %p781_p2, %p777_p3 }
  0x6d   : > { %785 = shalt.err (!%p782_p8)
}
  0x6e   : > { %569 = dma.vmem_to_hbm [thread:$0]  (%p959_p12), %s1044_s30, 128, %s1046_s10, %s375_s5  }
  0x6f PF: > { %s415_s24 = sand.u32 1, %s841_s12   ;;  %p580_p4 = pnand %p541_p13, %p964_p0 }
  0x70   : > { %s416_s20 = scalar_lea.sflag [#allocation6], %s415_s24 }
  0x71   : > { %p581_p11 = pneg %p580_p4 }
  0x73   : > { %831 = dma.done.wait (%p581_p11), %s416_s20, 128  }
  0x74   : > { %833 = vsyncadd (%p581_p11), %s416_s20, 4294967168  ;;  %s426_s6 = scalar_lea.sflag [#allocation11], %s415_s24 }
  0x75   : > { %835 = dma.done.wait (%p581_p11), %s426_s6, 128  }
  0x76   : > { %837 = vsyncadd (%p581_p11), %s426_s6, 4294967168  ;;  %s26_s19 = sadd.s32 1, %s869_s19   ;;  %s1113_s12 = smov %s845_s13 }
  0x77   : > { %p23_p1 = scmp.ge.s32.totalorder %s26_s19, 4   ;;  %s1114_s13 = smov %s849_s14 }
  0x78   : > { %s1115_s14 = smov %s953_s27  ;;  %s1116_s15 = smov %s857_s16 }
  0x79   : > { %s1091_s16 = smov 0   ;;  %s1117_s17 = smov %s865_s18 }
  0x7a   : > { %s1118_s18 = smov %s1120_s22  ;;  %25 = sbr.rel (!%p23_p1) target bundleno = 11 (0xb), region = 111 }
  0x7f   :  { %432 = vsyncpa [#allocation5], 1 }
  0x80   :  { %434 = vsyncpa [#allocation5 + $0x1], 1 }
  0x81   :  { %435 = vsyncpa [#allocation8], 1 }
  0x82   :  { %437 = vsyncpa [#allocation8 + $0x1], 1 }
  0x83   :  { %438 = vsyncpa [#allocation6], 1 }
  0x84   :  { %440 = vsyncpa [#allocation6 + $0x1], 1 }
  0x85   :  { %441 = vsyncpa [#allocation11], 1 }
  0x86   :  { %443 = vsyncpa [#allocation11 + $0x1], 1 }

</bundles_post_ra>
